<compile_context>
chip_gen: v5e
topology: v5e:2x2
jax: 0.10.0
libtpu: 0.0.40
codegen_flags: <defaults>
</compile_context>

<pallas_src>
import functools

import jax
import jax.numpy as jnp
from jax.experimental import pallas as pl
from jax.experimental.pallas import tpu as pltpu


def _round_up(v, m):
    return (v + m - 1) // m * m


def _cdiv(a, b):
    return -(-a // b)


def _vmem_limit_bytes():
    # ~75% of physical VMEM, capped at 96 MiB (v5e/v6e: 96 of 128 MiB,
    # v7x: 48 of 64 MiB).  Fallback keeps the old safe default.
    try:
        total = int(pltpu.get_tpu_info().vmem_capacity_bytes)
        return max(32 * 1024 * 1024, min(total * 3 // 4, 96 * 1024 * 1024))
    except Exception:
        return 32 * 1024 * 1024


VMEM_LIMIT = _vmem_limit_bytes()


def _choose_m_tiling(m):
    """Balanced M tiles: <=512 rows, multiple of 16, >=2 tiles when worthwhile."""
    n_t = max(1, _cdiv(m, 512))
    if n_t == 1 and m > 16:
        n_t = 2                      # keep both v7x TensorCores busy
    tm = _round_up(_cdiv(m, n_t), 16)
    return tm, n_t


def _choose_k_tiling(k_raw):
    """Pad K to a lane-dense multiple of 128 and split into <=1024-wide tiles."""
    k128 = _round_up(k_raw, 128)
    n_k = max(1, _cdiv(k128, 1024))
    tk = _round_up(_cdiv(k128, n_k), 128)
    return tk, n_k, n_k * tk


# --------------------------------------------------------------------------
# Pallas kernels
# --------------------------------------------------------------------------
def _matmul_act_kernel(x_ref, w_ref, o_ref, acc_ref, *, slope):
    """bf16 x bf16 matmul, f32 accumulation over the K grid axis, LeakyReLU."""
    @pl.when(pl.program_id(1) == 0)
    def _():
        acc_ref[...] = jnp.zeros_like(acc_ref)

    acc_ref[...] += jnp.dot(x_ref[...], w_ref[...],
                            preferred_element_type=jnp.float32)

    @pl.when(pl.program_id(1) == pl.num_programs(1) - 1)
    def _():
        acc = acc_ref[...]
        if slope is not None:
            acc = jnp.maximum(acc, slope * acc)      # LeakyReLU (0 < slope < 1)
        o_ref[...] = acc.astype(o_ref.dtype)


def _matmul_stats_kernel(x_ref, w_ref, o_ref, stats_ref, acc_ref):
    """BN pass 1: conv output (bf16) + per-tile (sum, sum-of-squares) partials."""
    @pl.when(pl.program_id(1) == 0)
    def _():
        acc_ref[...] = jnp.zeros_like(acc_ref)

    acc_ref[...] += jnp.dot(x_ref[...], w_ref[...],
                            preferred_element_type=jnp.float32)

    @pl.when(pl.program_id(1) == pl.num_programs(1) - 1)
    def _():
        acc = acc_ref[...]
        o_ref[...] = acc.astype(o_ref.dtype)         # bf16 intermediate to HBM
        # Only rows 0/1 of the 8-row stats block carry data; rows 2..7 are
        # never read by the wrapper (no zero-broadcast / extra stores).
        stats_ref[0:1, :] = jnp.sum(acc, axis=0, keepdims=True)
        stats_ref[1:2, :] = jnp.sum(acc * acc, axis=0, keepdims=True)


def _bn_act_kernel(y_ref, scale_ref, shift_ref, o_ref, *, slope):
    """BN pass 2: upcast bf16 conv output, y*scale + shift, LeakyReLU, cast."""
    y = y_ref[...].astype(jnp.float32) * scale_ref[...] + shift_ref[...]
    if slope is not None:
        y = jnp.maximum(y, slope * y)
    o_ref[...] = y.astype(o_ref.dtype)


# --------------------------------------------------------------------------
# pallas_call wrappers
# --------------------------------------------------------------------------
def _compiler_params(dims):
    return pltpu.CompilerParams(dimension_semantics=dims,
                                vmem_limit_bytes=VMEM_LIMIT)


def conv_matmul_act(patches, w_mat, *, slope, out_dtype, tm, tk):
    mp, kp = patches.shape
    c = w_mat.shape[1]
    n_m, n_k = mp // tm, kp // tk
    out_bytes = jnp.dtype(out_dtype).itemsize
    grid_spec = pltpu.PrefetchScalarGridSpec(
        num_scalar_prefetch=0, grid=(n_m, n_k),
        in_specs=[pl.BlockSpec((tm, tk), lambda i, k: (i, k)),
                  pl.BlockSpec((tk, c), lambda i, k: (k, 0))],
        out_specs=pl.BlockSpec((tm, c), lambda i, k: (i, 0)),
        scratch_shapes=[pltpu.VMEM((tm, c), jnp.float32)])
    return pl.pallas_call(
        functools.partial(_matmul_act_kernel, slope=slope),
        out_shape=jax.ShapeDtypeStruct((mp, c), out_dtype),
        grid_spec=grid_spec,
        compiler_params=_compiler_params(("parallel", "arbitrary")),
        cost_estimate=pl.CostEstimate(
            flops=2 * mp * kp * c, transcendentals=0,
            bytes_accessed=mp * kp * 2 + n_m * kp * c * 2 + mp * c * out_bytes),
    )(patches, w_mat)


def conv_matmul_stats(patches, w_mat, *, tm, tk):
    mp, kp = patches.shape
    c = w_mat.shape[1]
    n_m, n_k = mp // tm, kp // tk
    grid_spec = pltpu.PrefetchScalarGridSpec(
        num_scalar_prefetch=0, grid=(n_m, n_k),
        in_specs=[pl.BlockSpec((tm, tk), lambda i, k: (i, k)),
                  pl.BlockSpec((tk, c), lambda i, k: (k, 0))],
        out_specs=(pl.BlockSpec((tm, c), lambda i, k: (i, 0)),
                   pl.BlockSpec((8, c), lambda i, k: (i, 0))),
        scratch_shapes=[pltpu.VMEM((tm, c), jnp.float32)])
    conv, stats = pl.pallas_call(
        _matmul_stats_kernel,
        out_shape=(jax.ShapeDtypeStruct((mp, c), jnp.bfloat16),
                   jax.ShapeDtypeStruct((n_m * 8, c), jnp.float32)),
        grid_spec=grid_spec,
        compiler_params=_compiler_params(("parallel", "arbitrary")),
        cost_estimate=pl.CostEstimate(
            flops=2 * mp * kp * c + 3 * mp * c, transcendentals=0,
            bytes_accessed=mp * kp * 2 + n_m * kp * c * 2 + mp * c * 2
            + n_m * 8 * c * 4),
    )(patches, w_mat)
    return conv, stats.reshape(n_m, 8, c)


def bn_act_apply(y, scale, shift, *, slope, out_dtype, tm):
    mp, c = y.shape
    out_bytes = jnp.dtype(out_dtype).itemsize
    return pl.pallas_call(
        functools.partial(_bn_act_kernel, slope=slope),
        out_shape=jax.ShapeDtypeStruct((mp, c), out_dtype),
        grid=(mp // tm,),
        in_specs=[pl.BlockSpec((tm, c), lambda i: (i, 0)),
                  pl.BlockSpec((1, c), lambda i: (0, 0)),
                  pl.BlockSpec((1, c), lambda i: (0, 0))],
        out_specs=pl.BlockSpec((tm, c), lambda i: (i, 0)),
        compiler_params=_compiler_params(("parallel",)),
        cost_estimate=pl.CostEstimate(
            flops=4 * mp * c, transcendentals=0,
            bytes_accessed=mp * c * 2 + mp * c * out_bytes + 2 * c * 4),
    )(y, scale, shift)


# --------------------------------------------------------------------------
# Glue (plain JAX): im2col, parameter setup, layer loop
# --------------------------------------------------------------------------
def im2col(x, k, stride, pad):
    """x: [N, H, W, C] -> ([N*OH*OW, k*k*C], OH, OW)."""
    n, h, w, c = x.shape
    if pad > 0:
        x = jnp.pad(x, ((0, 0), (pad, pad), (pad, pad), (0, 0)))
    oh = (h + 2 * pad - k) // stride + 1
    ow = (w + 2 * pad - k) // stride + 1
    cols = []
    for i in range(k):
        for j in range(k):
            cols.append(x[:, i:i + stride * oh:stride, j:j + stride * ow:stride, :])
    patches = jnp.stack(cols, axis=3)  # [N, OH, OW, k*k, C]
    return patches.reshape(n * oh * ow, k * k * c), oh, ow


def build_encoder_params(key, isize, nz, nc, ndf, n_extra_layers=0,
                         add_final_conv=True):
    """Mirror Encoder.__init__ layer structure; deterministic synthetic params."""
    assert isize % 16 == 0, "isize has to be a multiple of 16"
    layers = []

    def add_layer(k_layer, cin, cout, ksz, stride, pad, do_bn, do_relu):
        kw, kg, kb = jax.random.split(k_layer, 3)
        w = 0.02 * jax.random.normal(kw, (cout, cin, ksz, ksz), jnp.float32)
        gamma = 1.0 + 0.1 * jax.random.normal(kg, (1, cout), jnp.float32)
        beta = 0.05 * jax.random.normal(kb, (1, cout), jnp.float32)
        cin_pad = _round_up(cin, 8)
        cout_pad = _round_up(cout, 128)
        k_raw = ksz * ksz * cin_pad
        tk, n_k, k_pad = _choose_k_tiling(k_raw)
        # [Cout, Cin, kh, kw] -> [kh, kw, Cin, Cout]; zero-pad channels + K.
        wt = jnp.transpose(w, (2, 3, 1, 0))
        wt = jnp.pad(wt, ((0, 0), (0, 0),
                          (0, cin_pad - cin), (0, cout_pad - cout)))
        w_mat = wt.reshape(k_raw, cout_pad)
        w_mat = jnp.pad(w_mat, ((0, k_pad - k_raw), (0, 0))).astype(jnp.bfloat16)
        gamma_p = jnp.pad(gamma, ((0, 0), (0, cout_pad - cout)))
        beta_p = jnp.pad(beta, ((0, 0), (0, cout_pad - cout)))
        layers.append(dict(
            w=w, gamma=gamma, beta=beta,                    # reference (unpadded)
            w_mat=w_mat, gamma_p=gamma_p, beta_p=beta_p,    # Pallas (padded)
            k=ksz, stride=stride, pad=pad, do_bn=do_bn, do_relu=do_relu,
            cin=cin, cout=cout, cin_pad=cin_pad, cout_pad=cout_pad,
            k_raw=k_raw, k_pad=k_pad, tk=tk, n_k=n_k))

    keys = jax.random.split(key, 32)
    ki = 0
    # initial conv + leaky relu
    add_layer(keys[ki], nc, ndf, 4, 2, 1, do_bn=False, do_relu=True); ki += 1
    csize, cndf = isize // 2, ndf
    # extra layers: 3x3/s1/p1 conv + BN + leaky relu
    for _ in range(n_extra_layers):
        add_layer(keys[ki], cndf, cndf, 3, 1, 1, do_bn=True, do_relu=True); ki += 1
    # pyramid: 4x4/s2/p1 conv + BN + leaky relu
    while csize > 4:
        add_layer(keys[ki], cndf, cndf * 2, 4, 2, 1, do_bn=True, do_relu=True); ki += 1
        cndf *= 2
        csize //= 2
    # final 4x4/s1/p0 conv -> [N, nz, 1, 1]
    if add_final_conv:
        add_layer(keys[ki], cndf, nz, 4, 1, 0, do_bn=False, do_relu=False); ki += 1
    return layers


def encoder_forward_pallas(x_nchw, layers):
    x = jnp.transpose(x_nchw, (0, 2, 3, 1)).astype(jnp.float32)   # -> NHWC
    c0 = layers[0]["cin_pad"]
    x = jnp.pad(x, ((0, 0), (0, 0), (0, 0), (0, c0 - x.shape[-1])))
    x = x.astype(jnp.bfloat16)

    n_layers = len(layers)
    for li, L in enumerate(layers):
        n = x.shape[0]
        xin = x[..., :L["cin_pad"]]                     # drop padded channels
        # TODO(synk): im2col patch matrix is still materialized by XLA (the
        # stride-2 window gather is not expressible with Blocked BlockSpec
        # index maps); an in-kernel manual-DMA gather would remove this
        # HBM round trip.
        patches, oh, ow = im2col(xin, L["k"], L["stride"], L["pad"])
        m = patches.shape[0]
        tm, n_m = _choose_m_tiling(m)
        mp = tm * n_m
        pad_m = mp - m
        pad_k = L["k_pad"] - L["k_raw"]
        if pad_m or pad_k:
            patches = jnp.pad(patches, ((0, pad_m), (0, pad_k)))
        patches = patches.astype(jnp.bfloat16)

        is_last = (li == n_layers - 1)
        out_dtype = jnp.float32 if is_last else jnp.bfloat16
        slope = 0.2 if L["do_relu"] else None

        if L["do_bn"]:
            conv, stats = conv_matmul_stats(patches, L["w_mat"],
                                            tm=tm, tk=L["tk"])
            # Training-mode BatchNorm2d: batch stats over the m real rows.
            # Padded rows are exactly zero (bias-free conv) so they add 0.
            s = jnp.sum(stats[:, 0, :], axis=0)
            ss = jnp.sum(stats[:, 1, :], axis=0)
            mean = s / m
            var = jnp.maximum(ss / m - mean * mean, 0.0)  # biased variance
            scale = L["gamma_p"] * jax.lax.rsqrt(var + 1e-5)
            shift = L["beta_p"] - mean * scale
            out = bn_act_apply(conv, scale.astype(jnp.float32),
                               shift.astype(jnp.float32),
                               slope=slope, out_dtype=out_dtype, tm=tm)
        else:
            out = conv_matmul_act(patches, L["w_mat"], slope=slope,
                                  out_dtype=out_dtype, tm=tm, tk=L["tk"])

        x = out[:m].reshape(n, oh, ow, L["cout_pad"])

    x = x[..., :layers[-1]["cout"]]                      # drop channel padding
    return jnp.transpose(x, (0, 3, 1, 2))                # -> NCHW [N, nz, 1, 1]


# --------------------------------------------------------------------------
# Pure-JAX reference (emulates the same bf16 quantization points)
# --------------------------------------------------------------------------
def encoder_forward_ref(x_nchw, layers):
    x = x_nchw.astype(jnp.float32)
    for L in layers:
        xq = x.astype(jnp.bfloat16).astype(jnp.float32)
        wq = L["w"].astype(jnp.bfloat16).astype(jnp.float32)
        x = jax.lax.conv_general_dilated(
            xq, wq, (L["stride"], L["stride"]),
            [(L["pad"], L["pad"]), (L["pad"], L["pad"])],
            dimension_numbers=("NCHW", "OIHW", "NCHW"))
        if L["do_bn"]:
            mean = jnp.mean(x, axis=(0, 2, 3), keepdims=True)
            var = jnp.mean(jnp.square(x - mean), axis=(0, 2, 3), keepdims=True)
            g = L["gamma"].reshape(1, -1, 1, 1)
            b = L["beta"].reshape(1, -1, 1, 1)
            scale = g * jax.lax.rsqrt(var + 1e-5)
            shift = b - mean * scale
            # Mirror the kernel's bf16 storage of the conv intermediate.
            xq2 = x.astype(jnp.bfloat16).astype(jnp.float32)
            x = xq2 * scale + shift
        if L["do_relu"]:
            x = jnp.where(x >= 0.0, x, 0.2 * x)
    return x


if __name__ == "__main__":
    # Small DCGAN-encoder config: isize=16 (multiple of 16), nc=3, ndf=8, nz=32
    isize, nz, nc, ndf, n_extra = 16, 32, 3, 8, 1
    key = jax.random.PRNGKey(0)
    k_params, k_x = jax.random.split(key)

    layers = build_encoder_params(k_params, isize, nz, nc, ndf,
                                  n_extra_layers=n_extra, add_final_conv=True)
    x = jax.random.normal(k_x, (2, nc, isize, isize), jnp.float32)

    fwd = jax.jit(lambda inp: encoder_forward_pallas(inp, layers))
    out = jax.block_until_ready(fwd(x))
    assert out.shape == (2, nz, 1, 1), out.shape

    ref_fn = jax.jit(lambda inp: encoder_forward_ref(inp, layers))
    ref = jax.block_until_ready(ref_fn(x))
    err = float(jnp.max(jnp.abs(out - ref)))
    assert err < 5e-3, f"mismatch vs reference: {err}"

    print("KERNEL_OK")
</pallas_src>

<mosaic_0001>
module attributes {stable_mosaic.version = 11 : i64} {
  func.func @_matmul_act_kernel(%arg0: i32, %arg1: i32, %arg2: memref<64x128xbf16, #tpu.memory_space<vmem>>, %arg3: memref<128x128xbf16, #tpu.memory_space<vmem>>, %arg4: memref<64x128xbf16, #tpu.memory_space<vmem>>, %arg5: memref<64x128xf32, #tpu.memory_space<vmem>>) attributes {dimension_semantics = [#tpu.dimension_semantics<parallel>, #tpu.dimension_semantics<arbitrary>], iteration_bounds = array<i64: 2, 1>, scalar_prefetch = 0 : i64, scratch_operands = 1 : i64, tpu.core_type = #tpu.core_type<tc>, window_params = [{transform_indices = @transform_0, window_bounds = array<i64: 64, 128>}, {transform_indices = @transform_1, window_bounds = array<i64: 128, 128>}, {transform_indices = @transform_2, window_bounds = array<i64: 64, 128>}]} {
    %c0_i32 = arith.constant 0 : i32
    %0 = arith.cmpi eq, %arg1, %c0_i32 : i32
    %1 = arith.extui %0 : i1 to i32
    %c0_i32_0 = arith.constant 0 : i32
    %2 = arith.cmpi ne, %1, %c0_i32_0 : i32
    scf.if %2 {
      %cst_10 = arith.constant 0.000000e+00 : f32
      %12 = vector.broadcast %cst_10 : f32 to vector<64x128xf32>
      %c0_11 = arith.constant 0 : index
      %c0_12 = arith.constant 0 : index
      %13 = vector.load %arg5[%c0_11, %c0_12] : memref<64x128xf32, #tpu.memory_space<vmem>>, vector<64x128xf32>
      tpu.vector_store %arg5[%c0_11, %c0_12], %12 {strides = array<i32>} : memref<64x128xf32, #tpu.memory_space<vmem>>, vector<64x128xf32>,
    } else {
    }
    %c0 = arith.constant 0 : index
    %c0_1 = arith.constant 0 : index
    %3 = vector.load %arg5[%c0, %c0_1] : memref<64x128xf32, #tpu.memory_space<vmem>>, vector<64x128xf32>
    %c0_2 = arith.constant 0 : index
    %c0_3 = arith.constant 0 : index
    %4 = vector.load %arg2[%c0_2, %c0_3] : memref<64x128xbf16, #tpu.memory_space<vmem>>, vector<64x128xbf16>
    %c0_4 = arith.constant 0 : index
    %c0_5 = arith.constant 0 : index
    %5 = vector.load %arg3[%c0_4, %c0_5] : memref<128x128xbf16, #tpu.memory_space<vmem>>, vector<128x128xbf16>
    %cst = arith.constant dense<0.000000e+00> : vector<64x128xf32>
    %6 = tpu.matmul %4, %5, %cst {dimension_numbers = #tpu.dot_dimension_numbers<[1], [0], [0], [1], [0, 0, 1, 1], [], []>} : vector<64x128xbf16>, vector<128x128xbf16>, vector<64x128xf32> -> vector<64x128xf32>
    %7 = arith.addf %3, %6 : vector<64x128xf32>
    %c0_6 = arith.constant 0 : index
    %c0_7 = arith.constant 0 : index
    %8 = vector.load %arg5[%c0_6, %c0_7] : memref<64x128xf32, #tpu.memory_space<vmem>>, vector<64x128xf32>
    tpu.vector_store %arg5[%c0_6, %c0_7], %7 {strides = array<i32>} : memref<64x128xf32, #tpu.memory_space<vmem>>, vector<64x128xf32>,
    %c0_i32_8 = arith.constant 0 : i32
    %9 = arith.cmpi eq, %arg1, %c0_i32_8 : i32
    %10 = arith.extui %9 : i1 to i32
    %c0_i32_9 = arith.constant 0 : i32
    %11 = arith.cmpi ne, %10, %c0_i32_9 : i32
    scf.if %11 {
      %c0_10 = arith.constant 0 : index
      %c0_11 = arith.constant 0 : index
      %12 = vector.load %arg5[%c0_10, %c0_11] : memref<64x128xf32, #tpu.memory_space<vmem>>, vector<64x128xf32>
      %cst_12 = arith.constant 2.000000e-01 : f32
      %13 = vector.broadcast %cst_12 : f32 to vector<64x128xf32>
      %14 = arith.mulf %13, %12 : vector<64x128xf32>
      %15 = arith.maximumf %12, %14 : vector<64x128xf32>
      %16 = arith.truncf %15 : vector<64x128xf32> to vector<64x128xbf16>
      %c0_13 = arith.constant 0 : index
      %c0_14 = arith.constant 0 : index
      %17 = vector.load %arg4[%c0_13, %c0_14] : memref<64x128xbf16, #tpu.memory_space<vmem>>, vector<64x128xbf16>
      tpu.vector_store %arg4[%c0_13, %c0_14], %16 {strides = array<i32>} : memref<64x128xbf16, #tpu.memory_space<vmem>>, vector<64x128xbf16>,
    } else {
    }
    return
  }
  func.func @transform_0(%arg0: i32, %arg1: i32) -> (i32, i32) {
    %c0_i32 = arith.constant 0 : i32
    return %arg0, %arg1 : i32, i32
  }
  func.func @transform_1(%arg0: i32, %arg1: i32) -> (i32, i32) {
    %c0_i32 = arith.constant 0 : i32
    %c0_i32_0 = arith.constant 0 : i32
    return %arg1, %c0_i32 : i32, i32
  }
  func.func @transform_2(%arg0: i32, %arg1: i32) -> (i32, i32) {
    %c0_i32 = arith.constant 0 : i32
    %c0_i32_0 = arith.constant 0 : i32
    return %arg0, %c0_i32 : i32, i32
  }
}

module attributes {stable_mosaic.version = 11 : i64} {
  func.func @_matmul_stats_kernel(%arg0: i32, %arg1: i32, %arg2: memref<64x128xbf16, #tpu.memory_space<vmem>>, %arg3: memref<128x128xbf16, #tpu.memory_space<vmem>>, %arg4: memref<64x128xbf16, #tpu.memory_space<vmem>>, %arg5: memref<8x128xf32, #tpu.memory_space<vmem>>, %arg6: memref<64x128xf32, #tpu.memory_space<vmem>>) attributes {dimension_semantics = [#tpu.dimension_semantics<parallel>, #tpu.dimension_semantics<arbitrary>], iteration_bounds = array<i64: 2, 1>, scalar_prefetch = 0 : i64, scratch_operands = 1 : i64, tpu.core_type = #tpu.core_type<tc>, window_params = [{transform_indices = @transform_0, window_bounds = array<i64: 64, 128>}, {transform_indices = @transform_1, window_bounds = array<i64: 128, 128>}, {transform_indices = @transform_2, window_bounds = array<i64: 64, 128>}, {transform_indices = @transform_3, window_bounds = array<i64: 8, 128>}]} {
    %c0_i32 = arith.constant 0 : i32
    %0 = arith.cmpi eq, %arg1, %c0_i32 : i32
    %1 = arith.extui %0 : i1 to i32
    %c0_i32_0 = arith.constant 0 : i32
    %2 = arith.cmpi ne, %1, %c0_i32_0 : i32
    scf.if %2 {
      %cst_10 = arith.constant 0.000000e+00 : f32
      %12 = vector.broadcast %cst_10 : f32 to vector<64x128xf32>
      %c0_11 = arith.constant 0 : index
      %c0_12 = arith.constant 0 : index
      %13 = vector.load %arg6[%c0_11, %c0_12] : memref<64x128xf32, #tpu.memory_space<vmem>>, vector<64x128xf32>
      tpu.vector_store %arg6[%c0_11, %c0_12], %12 {strides = array<i32>} : memref<64x128xf32, #tpu.memory_space<vmem>>, vector<64x128xf32>,
    } else {
    }
    %c0 = arith.constant 0 : index
    %c0_1 = arith.constant 0 : index
    %3 = vector.load %arg6[%c0, %c0_1] : memref<64x128xf32, #tpu.memory_space<vmem>>, vector<64x128xf32>
    %c0_2 = arith.constant 0 : index
    %c0_3 = arith.constant 0 : index
    %4 = vector.load %arg2[%c0_2, %c0_3] : memref<64x128xbf16, #tpu.memory_space<vmem>>, vector<64x128xbf16>
    %c0_4 = arith.constant 0 : index
    %c0_5 = arith.constant 0 : index
    %5 = vector.load %arg3[%c0_4, %c0_5] : memref<128x128xbf16, #tpu.memory_space<vmem>>, vector<128x128xbf16>
    %cst = arith.constant dense<0.000000e+00> : vector<64x128xf32>
    %6 = tpu.matmul %4, %5, %cst {dimension_numbers = #tpu.dot_dimension_numbers<[1], [0], [0], [1], [0, 0, 1, 1], [], []>} : vector<64x128xbf16>, vector<128x128xbf16>, vector<64x128xf32> -> vector<64x128xf32>
    %7 = arith.addf %3, %6 : vector<64x128xf32>
    %c0_6 = arith.constant 0 : index
    %c0_7 = arith.constant 0 : index
    %8 = vector.load %arg6[%c0_6, %c0_7] : memref<64x128xf32, #tpu.memory_space<vmem>>, vector<64x128xf32>
    tpu.vector_store %arg6[%c0_6, %c0_7], %7 {strides = array<i32>} : memref<64x128xf32, #tpu.memory_space<vmem>>, vector<64x128xf32>,
    %c0_i32_8 = arith.constant 0 : i32
    %9 = arith.cmpi eq, %arg1, %c0_i32_8 : i32
    %10 = arith.extui %9 : i1 to i32
    %c0_i32_9 = arith.constant 0 : i32
    %11 = arith.cmpi ne, %10, %c0_i32_9 : i32
    scf.if %11 {
      %c0_10 = arith.constant 0 : index
      %c0_11 = arith.constant 0 : index
      %12 = vector.load %arg6[%c0_10, %c0_11] : memref<64x128xf32, #tpu.memory_space<vmem>>, vector<64x128xf32>
      %13 = arith.truncf %12 : vector<64x128xf32> to vector<64x128xbf16>
      %c0_12 = arith.constant 0 : index
      %c0_13 = arith.constant 0 : index
      %14 = vector.load %arg4[%c0_12, %c0_13] : memref<64x128xbf16, #tpu.memory_space<vmem>>, vector<64x128xbf16>
      tpu.vector_store %arg4[%c0_12, %c0_13], %13 {strides = array<i32>} : memref<64x128xbf16, #tpu.memory_space<vmem>>, vector<64x128xbf16>,
      %cst_14 = arith.constant dense<0.000000e+00> : vector<128xf32>
      %15 = vector.multi_reduction <add>, %12, %cst_14 [0] : vector<64x128xf32> to vector<128xf32>
      %16 = vector.shape_cast %15 : vector<128xf32> to vector<1x128xf32>
      %c0_15 = arith.constant 0 : index
      %c0_16 = arith.constant 0 : index
      %17 = vector.load %arg5[%c0_15, %c0_16] : memref<8x128xf32, #tpu.memory_space<vmem>>, vector<1x128xf32>
      tpu.vector_store %arg5[%c0_15, %c0_16], %16 {strides = array<i32>} : memref<8x128xf32, #tpu.memory_space<vmem>>, vector<1x128xf32>,
      %18 = arith.mulf %12, %12 : vector<64x128xf32>
      %cst_17 = arith.constant dense<0.000000e+00> : vector<128xf32>
      %19 = vector.multi_reduction <add>, %18, %cst_17 [0] : vector<64x128xf32> to vector<128xf32>
      %20 = vector.shape_cast %19 : vector<128xf32> to vector<1x128xf32>
      %c1 = arith.constant 1 : index
      %c0_18 = arith.constant 0 : index
      %21 = vector.load %arg5[%c1, %c0_18] : memref<8x128xf32, #tpu.memory_space<vmem>>, vector<1x128xf32>
      tpu.vector_store %arg5[%c1, %c0_18], %20 {strides = array<i32>} : memref<8x128xf32, #tpu.memory_space<vmem>>, vector<1x128xf32>,
    } else {
    }
    return
  }
  func.func @transform_0(%arg0: i32, %arg1: i32) -> (i32, i32) {
    %c0_i32 = arith.constant 0 : i32
    return %arg0, %arg1 : i32, i32
  }
  func.func @transform_1(%arg0: i32, %arg1: i32) -> (i32, i32) {
    %c0_i32 = arith.constant 0 : i32
    %c0_i32_0 = arith.constant 0 : i32
    return %arg1, %c0_i32 : i32, i32
  }
  func.func @transform_2(%arg0: i32, %arg1: i32) -> (i32, i32) {
    %c0_i32 = arith.constant 0 : i32
    %c0_i32_0 = arith.constant 0 : i32
    return %arg0, %c0_i32 : i32, i32
  }
  func.func @transform_3(%arg0: i32, %arg1: i32) -> (i32, i32) {
    %c0_i32 = arith.constant 0 : i32
    %c0_i32_0 = arith.constant 0 : i32
    return %arg0, %c0_i32 : i32, i32
  }
}

module attributes {stable_mosaic.version = 11 : i64} {
  func.func @_bn_act_kernel(%arg0: i32, %arg1: memref<64x128xbf16, #tpu.memory_space<vmem>>, %arg2: memref<1x128xf32, #tpu.memory_space<vmem>>, %arg3: memref<1x128xf32, #tpu.memory_space<vmem>>, %arg4: memref<64x128xbf16, #tpu.memory_space<vmem>>) attributes {dimension_semantics = [#tpu.dimension_semantics<parallel>], iteration_bounds = array<i64: 2>, scalar_prefetch = 0 : i64, scratch_operands = 0 : i64, tpu.core_type = #tpu.core_type<tc>, window_params = [{transform_indices = @transform_0, window_bounds = array<i64: 64, 128>}, {pipeline_mode = #tpu.pipeline_mode<synchronous>, transform_indices = @transform_1, window_bounds = array<i64: 1, 128>}, {pipeline_mode = #tpu.pipeline_mode<synchronous>, transform_indices = @transform_2, window_bounds = array<i64: 1, 128>}, {transform_indices = @transform_3, window_bounds = array<i64: 64, 128>}]} {
    %c0 = arith.constant 0 : index
    %c0_0 = arith.constant 0 : index
    %0 = vector.load %arg1[%c0, %c0_0] : memref<64x128xbf16, #tpu.memory_space<vmem>>, vector<64x128xbf16>
    %1 = arith.extf %0 : vector<64x128xbf16> to vector<64x128xf32>
    %c0_1 = arith.constant 0 : index
    %c0_2 = arith.constant 0 : index
    %2 = vector.load %arg2[%c0_1, %c0_2] : memref<1x128xf32, #tpu.memory_space<vmem>>, vector<1x128xf32>
    %3 = vector.broadcast %2 : vector<1x128xf32> to vector<64x128xf32>
    %4 = arith.mulf %1, %3 : vector<64x128xf32>
    %c0_3 = arith.constant 0 : index
    %c0_4 = arith.constant 0 : index
    %5 = vector.load %arg3[%c0_3, %c0_4] : memref<1x128xf32, #tpu.memory_space<vmem>>, vector<1x128xf32>
    %6 = vector.broadcast %5 : vector<1x128xf32> to vector<64x128xf32>
    %7 = arith.addf %4, %6 : vector<64x128xf32>
    %cst = arith.constant 2.000000e-01 : f32
    %8 = vector.broadcast %cst : f32 to vector<64x128xf32>
    %9 = arith.mulf %8, %7 : vector<64x128xf32>
    %10 = arith.maximumf %7, %9 : vector<64x128xf32>
    %11 = arith.truncf %10 : vector<64x128xf32> to vector<64x128xbf16>
    %c0_5 = arith.constant 0 : index
    %c0_6 = arith.constant 0 : index
    %12 = vector.load %arg4[%c0_5, %c0_6] : memref<64x128xbf16, #tpu.memory_space<vmem>>, vector<64x128xbf16>
    tpu.vector_store %arg4[%c0_5, %c0_6], %11 {strides = array<i32>} : memref<64x128xbf16, #tpu.memory_space<vmem>>, vector<64x128xbf16>,
    return
  }
  func.func @transform_0(%arg0: i32) -> (i32, i32) {
    %c0_i32 = arith.constant 0 : i32
    %c0_i32_0 = arith.constant 0 : i32
    return %arg0, %c0_i32 : i32, i32
  }
  func.func @transform_1(%arg0: i32) -> (i32, i32) {
    %c0_i32 = arith.constant 0 : i32
    %c0_i32_0 = arith.constant 0 : i32
    %c0_i32_1 = arith.constant 0 : i32
    return %c0_i32, %c0_i32_0 : i32, i32
  }
  func.func @transform_2(%arg0: i32) -> (i32, i32) {
    %c0_i32 = arith.constant 0 : i32
    %c0_i32_0 = arith.constant 0 : i32
    %c0_i32_1 = arith.constant 0 : i32
    return %c0_i32, %c0_i32_0 : i32, i32
  }
  func.func @transform_3(%arg0: i32) -> (i32, i32) {
    %c0_i32 = arith.constant 0 : i32
    %c0_i32_0 = arith.constant 0 : i32
    return %arg0, %c0_i32 : i32, i32
  }
}

module attributes {stable_mosaic.version = 11 : i64} {
  func.func @_matmul_stats_kernel(%arg0: i32, %arg1: i32, %arg2: memref<16x128xbf16, #tpu.memory_space<vmem>>, %arg3: memref<128x128xbf16, #tpu.memory_space<vmem>>, %arg4: memref<16x128xbf16, #tpu.memory_space<vmem>>, %arg5: memref<8x128xf32, #tpu.memory_space<vmem>>, %arg6: memref<16x128xf32, #tpu.memory_space<vmem>>) attributes {dimension_semantics = [#tpu.dimension_semantics<parallel>, #tpu.dimension_semantics<arbitrary>], iteration_bounds = array<i64: 2, 1>, scalar_prefetch = 0 : i64, scratch_operands = 1 : i64, tpu.core_type = #tpu.core_type<tc>, window_params = [{transform_indices = @transform_0, window_bounds = array<i64: 16, 128>}, {transform_indices = @transform_1, window_bounds = array<i64: 128, 128>}, {transform_indices = @transform_2, window_bounds = array<i64: 16, 128>}, {transform_indices = @transform_3, window_bounds = array<i64: 8, 128>}]} {
    %c0_i32 = arith.constant 0 : i32
    %0 = arith.cmpi eq, %arg1, %c0_i32 : i32
    %1 = arith.extui %0 : i1 to i32
    %c0_i32_0 = arith.constant 0 : i32
    %2 = arith.cmpi ne, %1, %c0_i32_0 : i32
    scf.if %2 {
      %cst_10 = arith.constant 0.000000e+00 : f32
      %12 = vector.broadcast %cst_10 : f32 to vector<16x128xf32>
      %c0_11 = arith.constant 0 : index
      %c0_12 = arith.constant 0 : index
      %13 = vector.load %arg6[%c0_11, %c0_12] : memref<16x128xf32, #tpu.memory_space<vmem>>, vector<16x128xf32>
      tpu.vector_store %arg6[%c0_11, %c0_12], %12 {strides = array<i32>} : memref<16x128xf32, #tpu.memory_space<vmem>>, vector<16x128xf32>,
    } else {
    }
    %c0 = arith.constant 0 : index
    %c0_1 = arith.constant 0 : index
    %3 = vector.load %arg6[%c0, %c0_1] : memref<16x128xf32, #tpu.memory_space<vmem>>, vector<16x128xf32>
    %c0_2 = arith.constant 0 : index
    %c0_3 = arith.constant 0 : index
    %4 = vector.load %arg2[%c0_2, %c0_3] : memref<16x128xbf16, #tpu.memory_space<vmem>>, vector<16x128xbf16>
    %c0_4 = arith.constant 0 : index
    %c0_5 = arith.constant 0 : index
    %5 = vector.load %arg3[%c0_4, %c0_5] : memref<128x128xbf16, #tpu.memory_space<vmem>>, vector<128x128xbf16>
    %cst = arith.constant dense<0.000000e+00> : vector<16x128xf32>
    %6 = tpu.matmul %4, %5, %cst {dimension_numbers = #tpu.dot_dimension_numbers<[1], [0], [0], [1], [0, 0, 1, 1], [], []>} : vector<16x128xbf16>, vector<128x128xbf16>, vector<16x128xf32> -> vector<16x128xf32>
    %7 = arith.addf %3, %6 : vector<16x128xf32>
    %c0_6 = arith.constant 0 : index
    %c0_7 = arith.constant 0 : index
    %8 = vector.load %arg6[%c0_6, %c0_7] : memref<16x128xf32, #tpu.memory_space<vmem>>, vector<16x128xf32>
    tpu.vector_store %arg6[%c0_6, %c0_7], %7 {strides = array<i32>} : memref<16x128xf32, #tpu.memory_space<vmem>>, vector<16x128xf32>,
    %c0_i32_8 = arith.constant 0 : i32
    %9 = arith.cmpi eq, %arg1, %c0_i32_8 : i32
    %10 = arith.extui %9 : i1 to i32
    %c0_i32_9 = arith.constant 0 : i32
    %11 = arith.cmpi ne, %10, %c0_i32_9 : i32
    scf.if %11 {
      %c0_10 = arith.constant 0 : index
      %c0_11 = arith.constant 0 : index
      %12 = vector.load %arg6[%c0_10, %c0_11] : memref<16x128xf32, #tpu.memory_space<vmem>>, vector<16x128xf32>
      %13 = arith.truncf %12 : vector<16x128xf32> to vector<16x128xbf16>
      %c0_12 = arith.constant 0 : index
      %c0_13 = arith.constant 0 : index
      %14 = vector.load %arg4[%c0_12, %c0_13] : memref<16x128xbf16, #tpu.memory_space<vmem>>, vector<16x128xbf16>
      tpu.vector_store %arg4[%c0_12, %c0_13], %13 {strides = array<i32>} : memref<16x128xbf16, #tpu.memory_space<vmem>>, vector<16x128xbf16>,
      %cst_14 = arith.constant dense<0.000000e+00> : vector<128xf32>
      %15 = vector.multi_reduction <add>, %12, %cst_14 [0] : vector<16x128xf32> to vector<128xf32>
      %16 = vector.shape_cast %15 : vector<128xf32> to vector<1x128xf32>
      %c0_15 = arith.constant 0 : index
      %c0_16 = arith.constant 0 : index
      %17 = vector.load %arg5[%c0_15, %c0_16] : memref<8x128xf32, #tpu.memory_space<vmem>>, vector<1x128xf32>
      tpu.vector_store %arg5[%c0_15, %c0_16], %16 {strides = array<i32>} : memref<8x128xf32, #tpu.memory_space<vmem>>, vector<1x128xf32>,
      %18 = arith.mulf %12, %12 : vector<16x128xf32>
      %cst_17 = arith.constant dense<0.000000e+00> : vector<128xf32>
      %19 = vector.multi_reduction <add>, %18, %cst_17 [0] : vector<16x128xf32> to vector<128xf32>
      %20 = vector.shape_cast %19 : vector<128xf32> to vector<1x128xf32>
      %c1 = arith.constant 1 : index
      %c0_18 = arith.constant 0 : index
      %21 = vector.load %arg5[%c1, %c0_18] : memref<8x128xf32, #tpu.memory_space<vmem>>, vector<1x128xf32>
      tpu.vector_store %arg5[%c1, %c0_18], %20 {strides = array<i32>} : memref<8x128xf32, #tpu.memory_space<vmem>>, vector<1x128xf32>,
    } else {
    }
    return
  }
  func.func @transform_0(%arg0: i32, %arg1: i32) -> (i32, i32) {
    %c0_i32 = arith.constant 0 : i32
    return %arg0, %arg1 : i32, i32
  }
  func.func @transform_1(%arg0: i32, %arg1: i32) -> (i32, i32) {
    %c0_i32 = arith.constant 0 : i32
    %c0_i32_0 = arith.constant 0 : i32
    return %arg1, %c0_i32 : i32, i32
  }
  func.func @transform_2(%arg0: i32, %arg1: i32) -> (i32, i32) {
    %c0_i32 = arith.constant 0 : i32
    %c0_i32_0 = arith.constant 0 : i32
    return %arg0, %c0_i32 : i32, i32
  }
  func.func @transform_3(%arg0: i32, %arg1: i32) -> (i32, i32) {
    %c0_i32 = arith.constant 0 : i32
    %c0_i32_0 = arith.constant 0 : i32
    return %arg0, %c0_i32 : i32, i32
  }
}

module attributes {stable_mosaic.version = 11 : i64} {
  func.func @_bn_act_kernel(%arg0: i32, %arg1: memref<16x128xbf16, #tpu.memory_space<vmem>>, %arg2: memref<1x128xf32, #tpu.memory_space<vmem>>, %arg3: memref<1x128xf32, #tpu.memory_space<vmem>>, %arg4: memref<16x128xbf16, #tpu.memory_space<vmem>>) attributes {dimension_semantics = [#tpu.dimension_semantics<parallel>], iteration_bounds = array<i64: 2>, scalar_prefetch = 0 : i64, scratch_operands = 0 : i64, tpu.core_type = #tpu.core_type<tc>, window_params = [{transform_indices = @transform_0, window_bounds = array<i64: 16, 128>}, {pipeline_mode = #tpu.pipeline_mode<synchronous>, transform_indices = @transform_1, window_bounds = array<i64: 1, 128>}, {pipeline_mode = #tpu.pipeline_mode<synchronous>, transform_indices = @transform_2, window_bounds = array<i64: 1, 128>}, {transform_indices = @transform_3, window_bounds = array<i64: 16, 128>}]} {
    %c0 = arith.constant 0 : index
    %c0_0 = arith.constant 0 : index
    %0 = vector.load %arg1[%c0, %c0_0] : memref<16x128xbf16, #tpu.memory_space<vmem>>, vector<16x128xbf16>
    %1 = arith.extf %0 : vector<16x128xbf16> to vector<16x128xf32>
    %c0_1 = arith.constant 0 : index
    %c0_2 = arith.constant 0 : index
    %2 = vector.load %arg2[%c0_1, %c0_2] : memref<1x128xf32, #tpu.memory_space<vmem>>, vector<1x128xf32>
    %3 = vector.broadcast %2 : vector<1x128xf32> to vector<16x128xf32>
    %4 = arith.mulf %1, %3 : vector<16x128xf32>
    %c0_3 = arith.constant 0 : index
    %c0_4 = arith.constant 0 : index
    %5 = vector.load %arg3[%c0_3, %c0_4] : memref<1x128xf32, #tpu.memory_space<vmem>>, vector<1x128xf32>
    %6 = vector.broadcast %5 : vector<1x128xf32> to vector<16x128xf32>
    %7 = arith.addf %4, %6 : vector<16x128xf32>
    %cst = arith.constant 2.000000e-01 : f32
    %8 = vector.broadcast %cst : f32 to vector<16x128xf32>
    %9 = arith.mulf %8, %7 : vector<16x128xf32>
    %10 = arith.maximumf %7, %9 : vector<16x128xf32>
    %11 = arith.truncf %10 : vector<16x128xf32> to vector<16x128xbf16>
    %c0_5 = arith.constant 0 : index
    %c0_6 = arith.constant 0 : index
    %12 = vector.load %arg4[%c0_5, %c0_6] : memref<16x128xbf16, #tpu.memory_space<vmem>>, vector<16x128xbf16>
    tpu.vector_store %arg4[%c0_5, %c0_6], %11 {strides = array<i32>} : memref<16x128xbf16, #tpu.memory_space<vmem>>, vector<16x128xbf16>,
    return
  }
  func.func @transform_0(%arg0: i32) -> (i32, i32) {
    %c0_i32 = arith.constant 0 : i32
    %c0_i32_0 = arith.constant 0 : i32
    return %arg0, %c0_i32 : i32, i32
  }
  func.func @transform_1(%arg0: i32) -> (i32, i32) {
    %c0_i32 = arith.constant 0 : i32
    %c0_i32_0 = arith.constant 0 : i32
    %c0_i32_1 = arith.constant 0 : i32
    return %c0_i32, %c0_i32_0 : i32, i32
  }
  func.func @transform_2(%arg0: i32) -> (i32, i32) {
    %c0_i32 = arith.constant 0 : i32
    %c0_i32_0 = arith.constant 0 : i32
    %c0_i32_1 = arith.constant 0 : i32
    return %c0_i32, %c0_i32_0 : i32, i32
  }
  func.func @transform_3(%arg0: i32) -> (i32, i32) {
    %c0_i32 = arith.constant 0 : i32
    %c0_i32_0 = arith.constant 0 : i32
    return %arg0, %c0_i32 : i32, i32
  }
}

module attributes {stable_mosaic.version = 11 : i64} {
  func.func @_matmul_act_kernel(%arg0: i32, %arg1: i32, %arg2: memref<16x256xbf16, #tpu.memory_space<vmem>>, %arg3: memref<256x128xbf16, #tpu.memory_space<vmem>>, %arg4: memref<16x128xf32, #tpu.memory_space<vmem>>, %arg5: memref<16x128xf32, #tpu.memory_space<vmem>>) attributes {dimension_semantics = [#tpu.dimension_semantics<parallel>, #tpu.dimension_semantics<arbitrary>], iteration_bounds = array<i64: 1, 1>, scalar_prefetch = 0 : i64, scratch_operands = 1 : i64, tpu.core_type = #tpu.core_type<tc>, window_params = [{transform_indices = @transform_0, window_bounds = array<i64: 16, 256>}, {transform_indices = @transform_1, window_bounds = array<i64: 256, 128>}, {transform_indices = @transform_2, window_bounds = array<i64: 16, 128>}]} {
    %c0_i32 = arith.constant 0 : i32
    %0 = arith.cmpi eq, %arg1, %c0_i32 : i32
    %1 = arith.extui %0 : i1 to i32
    %c0_i32_0 = arith.constant 0 : i32
    %2 = arith.cmpi ne, %1, %c0_i32_0 : i32
    scf.if %2 {
      %cst_10 = arith.constant 0.000000e+00 : f32
      %12 = vector.broadcast %cst_10 : f32 to vector<16x128xf32>
      %c0_11 = arith.constant 0 : index
      %c0_12 = arith.constant 0 : index
      %13 = vector.load %arg5[%c0_11, %c0_12] : memref<16x128xf32, #tpu.memory_space<vmem>>, vector<16x128xf32>
      tpu.vector_store %arg5[%c0_11, %c0_12], %12 {strides = array<i32>} : memref<16x128xf32, #tpu.memory_space<vmem>>, vector<16x128xf32>,
    } else {
    }
    %c0 = arith.constant 0 : index
    %c0_1 = arith.constant 0 : index
    %3 = vector.load %arg5[%c0, %c0_1] : memref<16x128xf32, #tpu.memory_space<vmem>>, vector<16x128xf32>
    %c0_2 = arith.constant 0 : index
    %c0_3 = arith.constant 0 : index
    %4 = vector.load %arg2[%c0_2, %c0_3] : memref<16x256xbf16, #tpu.memory_space<vmem>>, vector<16x256xbf16>
    %c0_4 = arith.constant 0 : index
    %c0_5 = arith.constant 0 : index
    %5 = vector.load %arg3[%c0_4, %c0_5] : memref<256x128xbf16, #tpu.memory_space<vmem>>, vector<256x128xbf16>
    %cst = arith.constant dense<0.000000e+00> : vector<16x128xf32>
    %6 = tpu.matmul %4, %5, %cst {dimension_numbers = #tpu.dot_dimension_numbers<[1], [0], [0], [1], [0, 0, 1, 1], [], []>} : vector<16x256xbf16>, vector<256x128xbf16>, vector<16x128xf32> -> vector<16x128xf32>
    %7 = arith.addf %3, %6 : vector<16x128xf32>
    %c0_6 = arith.constant 0 : index
    %c0_7 = arith.constant 0 : index
    %8 = vector.load %arg5[%c0_6, %c0_7] : memref<16x128xf32, #tpu.memory_space<vmem>>, vector<16x128xf32>
    tpu.vector_store %arg5[%c0_6, %c0_7], %7 {strides = array<i32>} : memref<16x128xf32, #tpu.memory_space<vmem>>, vector<16x128xf32>,
    %c0_i32_8 = arith.constant 0 : i32
    %9 = arith.cmpi eq, %arg1, %c0_i32_8 : i32
    %10 = arith.extui %9 : i1 to i32
    %c0_i32_9 = arith.constant 0 : i32
    %11 = arith.cmpi ne, %10, %c0_i32_9 : i32
    scf.if %11 {
      %c0_10 = arith.constant 0 : index
      %c0_11 = arith.constant 0 : index
      %12 = vector.load %arg5[%c0_10, %c0_11] : memref<16x128xf32, #tpu.memory_space<vmem>>, vector<16x128xf32>
      %c0_12 = arith.constant 0 : index
      %c0_13 = arith.constant 0 : index
      %13 = vector.load %arg4[%c0_12, %c0_13] : memref<16x128xf32, #tpu.memory_space<vmem>>, vector<16x128xf32>
      tpu.vector_store %arg4[%c0_12, %c0_13], %12 {strides = array<i32>} : memref<16x128xf32, #tpu.memory_space<vmem>>, vector<16x128xf32>,
    } else {
    }
    return
  }
  func.func @transform_0(%arg0: i32, %arg1: i32) -> (i32, i32) {
    %c0_i32 = arith.constant 0 : i32
    return %arg0, %arg1 : i32, i32
  }
  func.func @transform_1(%arg0: i32, %arg1: i32) -> (i32, i32) {
    %c0_i32 = arith.constant 0 : i32
    %c0_i32_0 = arith.constant 0 : i32
    return %arg1, %c0_i32 : i32, i32
  }
  func.func @transform_2(%arg0: i32, %arg1: i32) -> (i32, i32) {
    %c0_i32 = arith.constant 0 : i32
    %c0_i32_0 = arith.constant 0 : i32
    return %arg0, %c0_i32 : i32, i32
  }
}

</mosaic_0001>

<bundles_post_ra>
// kernel: _lambda_.6
= control target key start
LH: loop header
LB: loop body
LE: loop exit
PB: predicated region body
PF: predicated region fallthrough
CT: control target
= control target key end

     0   :  { %s661_s9 = smov 0   ;;  %s663_s10 = smov 0   ;;  %s728_s0 = inlined_call_operand.vmem [shape: bf16[128,128], index: 0, kind: input, shape index: {}]   ;;  %s729_s1 = inlined_call_operand.vmem [shape: bf16[128,128], index: 1, kind: input, shape index: {}]   ;;  %s730_s2 = inlined_call_operand.vmem [shape: bf16[128,128], index: 2, kind: output, shape index: {}]  }
   0x1   :  { %s665_s11 = smov 0  }
   0x2 LB: > { %s24_s12 = sadd.s32 1, %s640_s10  ;;  %p484_p0 = scmp.ge.s32.totalorder %s644_s11, 1  ;;  %s644_s11 = sphi %s665_s11, %s12_s11   ;;  %s640_s10 = sphi %s663_s10, %s732_s10   ;;  %s636_s9 = sphi %s661_s9, %s731_s9  }
   0x3   : > { %p26_p1 = scmp.ge.s32.totalorder %s24_s12, 2  ;;  %p141_p2 = scmp.lt.s32.totalorder %s644_s11, 3 }
   0x5   : > { %s734_s12 = smov (%p26_p1, %s24_s12), 0  ;;  %p142_p3 = pnand %p484_p0, %p141_p2 }
   0x6   : > { %s485_s21 = sshll.u32 (!%p142_p3), %s636_s9, 3 }
   0x7   : > { %145 = sbr.rel (%p142_p3) target bundleno = 193 (0xc1), region = 28  ;;  %p172_p4 = scmp.lt.s32.totalorder (!%p142_p3), %s485_s21, 15 }
   0xc   : > { %v550_v0 = vld [vmem:[%s729_s1 + $0x38] sm:$0xff]  ;;  %v549_v1 = vld [vmem:[%s729_s1 + $0x30] sm:$0xff]  ;;  %v548_v2 = vld [vmem:[%s729_s1 + $0x28] sm:$0xff]  ;;  %s736_s21 = smov (!%p172_p4, %s485_s21), 15 }
   0xd   : > { %308 = vmatpush.bf16.msra.mxu0 %v550_v0  ;;  %574 = vmatpush.bf16.msra.mxu1 %v550_v0  ;;  %v547_v3 = vld [vmem:[%s729_s1 + $0x20] sm:$0xff]  ;;  %v546_v4 = vld [vmem:[%s729_s1 + $0x18] sm:$0xff]  ;;  %v545_v5 = vld [vmem:[%s729_s1 + $0x10] sm:$0xff]  ;;  %s486_s28 = sshll.u32 %s736_s21, 2 }
   0xe   : > { %575 = vmatpush.bf16.msra.mxu2 %v550_v0  ;;  %576 = vmatpush.bf16.msra.mxu3 %v550_v0  ;;  %v544_v6 = vld [vmem:[%s729_s1 + $0x8] sm:$0xff]  ;;  %v543_v7 = vld [vmem:[%s729_s1] sm:$0xff]  ;;  %s178_s5 = scalar_lea.vmem %s728_s0, %s486_s28  ;;  %s190_s8 = scalar_lea.vmem %s730_s2, %s486_s28 }
   0xf   : > { %v539_v8 = vld [vmem:[%s178_s5] sm:$0xff]  ;;  %v540_v9 = vld [vmem:[%s178_s5 + $0x8] sm:$0xff]  ;;  %v541_v10 = vld [vmem:[%s178_s5 + $0x10] sm:$0xff] }
  0x10   : > { %v542_v11 = vld [vmem:[%s178_s5 + $0x18] sm:$0xff] }
  0x11   : > { %309 = vmatpush.bf16.msra.mxu0 %v549_v1  ;;  %577 = vmatpush.bf16.msra.mxu1 %v549_v1 }
  0x12   : > { %578 = vmatpush.bf16.msra.mxu2 %v549_v1  ;;  %579 = vmatpush.bf16.msra.mxu3 %v549_v1 }
  0x15   : > { %310 = vmatpush.bf16.msra.mxu0 %v548_v2  ;;  %580 = vmatpush.bf16.msra.mxu1 %v548_v2 }
  0x16   : > { %581 = vmatpush.bf16.msra.mxu2 %v548_v2  ;;  %582 = vmatpush.bf16.msra.mxu3 %v548_v2 }
  0x19   : > { %311 = vmatpush.bf16.msra.mxu0 %v547_v3  ;;  %583 = vmatpush.bf16.msra.mxu1 %v547_v3 }
  0x1a   : > { %584 = vmatpush.bf16.msra.mxu2 %v547_v3  ;;  %585 = vmatpush.bf16.msra.mxu3 %v547_v3 }
  0x1d   : > { %312 = vmatpush.bf16.msra.mxu0 %v546_v4  ;;  %586 = vmatpush.bf16.msra.mxu1 %v546_v4 }
  0x1e   : > { %587 = vmatpush.bf16.msra.mxu2 %v546_v4  ;;  %588 = vmatpush.bf16.msra.mxu3 %v546_v4 }
  0x21   : > { %313 = vmatpush.bf16.msra.mxu0 %v545_v5  ;;  %589 = vmatpush.bf16.msra.mxu1 %v545_v5 }
  0x22   : > { %590 = vmatpush.bf16.msra.mxu2 %v545_v5  ;;  %591 = vmatpush.bf16.msra.mxu3 %v545_v5 }
  0x25   : > { %314 = vmatpush.bf16.msra.mxu0 %v544_v6  ;;  %592 = vmatpush.bf16.msra.mxu1 %v544_v6 }
  0x26   : > { %593 = vmatpush.bf16.msra.mxu2 %v544_v6  ;;  %594 = vmatpush.bf16.msra.mxu3 %v544_v6 }
  0x29   : > { %315 = vmatpush.bf16.msra.mxu0 %v543_v7  ;;  %595 = vmatpush.bf16.msra.mxu1 %v543_v7 }
  0x2a   : > { %596 = vmatpush.bf16.msra.mxu2 %v543_v7  ;;  %597 = vmatpush.bf16.msra.mxu3 %v543_v7 }
  0x2c   : > { %316 = vmatmul.bf16.vlgmr.msra.gmra.mxu0 %v539_v8  ;;  %321 = vmatmul.bf16.vlgmr.msra.gmra.mxu1 %v540_v9 }
  0x2d   : > { %326 = vmatmul.bf16.vlgmr.msra.gmra.mxu2 %v541_v10  ;;  %331 = vmatmul.bf16.vlgmr.msra.gmra.mxu3 %v542_v11 }
  0xa9   : > { %v317_v12 = vpop.f32.mrf.mxu0  ;;  %v322_v13 = vpop.f32.mrf.mxu1 }
  0xaa   : > { %v364_v14 = vmul.f32 0.2, %v317_v12  ;;  %v366_v15 = vmul.f32 0.2, %v322_v13 }
  0xac   : > { %v372_v22 = vmax.f32 %v317_v12, %v364_v14  ;;  %v374_v23 = vmax.f32 %v322_v13, %v366_v15 }
  0xb0   : > { %v327_v16 = vpop.f32.mrf.mxu2  ;;  %v332_v17 = vpop.f32.mrf.mxu3 }
  0xb1   : > { %v319_v18 = vpop.f32.mrf.mxu0  ;;  %v324_v19 = vpop.f32.mrf.mxu1  ;;  %v368_v28 = vmul.f32 0.2, %v327_v16  ;;  %v370_v29 = vmul.f32 0.2, %v332_v17 }
  0xb2   : > { %v365_v20 = vmul.f32 0.2, %v319_v18  ;;  %v367_v21 = vmul.f32 0.2, %v324_v19 }
  0xb3   : > { %v376_v34 = vmax.f32 %v327_v16, %v368_v28  ;;  %v378_v35 = vmax.f32 %v332_v17, %v370_v29 }
  0xb4   : > { %v373_v24 = vmax.f32 %v319_v18, %v365_v20  ;;  %v375_v25 = vmax.f32 %v324_v19, %v367_v21 }
  0xb6   : > { %v554_v26 = vpack.c.bf16 %v373_v24, %v372_v22  ;;  %v559_v27 = vpack.c.bf16 %v375_v25, %v374_v23 }
  0xb8   : > { %555 = vst [vmem:[%s190_s8] sm:$0xff] %v554_v26   ;;  %v329_v30 = vpop.f32.mrf.mxu2  ;;  %v334_v31 = vpop.f32.mrf.mxu3 }
  0xb9   : > { %571 = vst [vmem:[%s190_s8 + $0x8] sm:$0xff] %v559_v27   ;;  %v369_v32 = vmul.f32 0.2, %v329_v30  ;;  %v371_v33 = vmul.f32 0.2, %v334_v31 }
  0xbb   : > { %v377_v36 = vmax.f32 %v329_v30, %v369_v32  ;;  %v379_v37 = vmax.f32 %v334_v31, %v371_v33 }
  0xbd   : > { %v564_v38 = vpack.c.bf16 %v377_v36, %v376_v34  ;;  %v569_v39 = vpack.c.bf16 %v379_v37, %v378_v35 }
  0xbf   : > { %572 = vst [vmem:[%s190_s8 + $0x10] sm:$0xff] %v564_v38  }
  0xc0   : > { %573 = vst [vmem:[%s190_s8 + $0x18] sm:$0xff] %v569_v39  }
  0xc1 PF: > { %s12_s11 = sadd.s32 1, %s644_s11   ;;  %s731_s9 = smov %s640_s10 }
  0xc2   : > { %p9_p5 = scmp.ge.s32.totalorder %s12_s11, 4   ;;  %s732_s10 = smov %s734_s12 }
  0xc4   :  { %11 = sbr.rel (!%p9_p5) target bundleno = 2 (0x2), region = 69 }

// kernel: _lambda_.8
= control target key start
LH: loop header
LB: loop body
LE: loop exit
PB: predicated region body
PF: predicated region fallthrough
CT: control target
= control target key end

     0   :  { %s393_s12 = smov 0   ;;  %s423_s0 = inlined_call_operand.vmem [shape: bf16[128,128], index: 0, kind: input, shape index: {}]   ;;  %s424_s1 = inlined_call_operand.vmem [shape: f32[1,128], index: 1, kind: input, shape index: {}]   ;;  %s425_s2 = inlined_call_operand.vmem [shape: f32[1,128], index: 2, kind: input, shape index: {}]   ;;  %s426_s3 = inlined_call_operand.vmem [shape: bf16[128,128], index: 3, kind: output, shape index: {}]  }
   0x1 LB: > { %s302_s13 = sadd.s32 4294967295, %s371_s12   ;;  %p306_p0 = scmp.ge.s32.totalorder %s371_s12, 1  ;;  %s371_s12 = sphi %s393_s12, %s13_s12  }
   0x2   : > { %p138_p1 = scmp.lt.s32.totalorder %s371_s12, 3 }
   0x4   : > { %p139_p2 = pnand %p306_p0, %p138_p1 }
   0x5   : > { %s307_s14 = sshll.u32 (!%p139_p2), %s302_s13, 3 }
   0x6   : > { %142 = sbr.rel (%p139_p2) target bundleno = 31 (0x1f), region = 32  ;;  %p163_p3 = scmp.lt.s32.totalorder (!%p139_p2), %s307_s14, 15 }
   0xb   : > { %s428_s14 = smov (!%p163_p3, %s307_s14), 15  ;;  %v363_v0 = vld [vmem:[%s424_s1] ss:$0 sm:$0xff] }
   0xc   : > { %s308_s15 = sshll.u32 %s428_s14, 2  ;;  %v364_v7 = vld [vmem:[%s425_s2] ss:$0 sm:$0xff] }
   0xd   : > { %s166_s18 = scalar_lea.vmem %s423_s0, %s308_s15  ;;  %s172_s25 = scalar_lea.vmem %s426_s3, %s308_s15 }
   0xe   : > { %v314_v1 = vld [vmem:[%s166_s18] sm:$0xff]   ;;  %v349_v2 = vld [vmem:[%s166_s18 + $0x8] sm:$0xff]   ;;  %v350_v3 = vld [vmem:[%s166_s18 + $0x10] sm:$0xff]  }
   0xf   : > { %v315_v4 = vunpack.c.l.bf16 %v314_v1  ;;  %v316_v5 = vunpack.c.h.bf16 %v314_v1  ;;  %v351_v6 = vld [vmem:[%s166_s18 + $0x18] sm:$0xff]   ;;  %v319_v8 = vunpack.c.l.bf16 %v349_v2  ;;  %v320_v9 = vunpack.c.h.bf16 %v349_v2 }
  0x10   : > { %v323_v10 = vunpack.c.l.bf16 %v350_v3  ;;  %v324_v11 = vunpack.c.h.bf16 %v350_v3  ;;  %v327_v12 = vunpack.c.l.bf16 %v351_v6  ;;  %v328_v13 = vunpack.c.h.bf16 %v351_v6 }
  0x11   : > { %v194_v14 = vmul.f32 %v363_v0, %v315_v4  ;;  %v195_v15 = vmul.f32 %v363_v0, %v316_v5  ;;  %v196_v16 = vmul.f32 %v363_v0, %v319_v8  ;;  %v197_v17 = vmul.f32 %v363_v0, %v320_v9 }
  0x12   : > { %v198_v18 = vmul.f32 %v363_v0, %v323_v10  ;;  %v199_v19 = vmul.f32 %v363_v0, %v324_v11  ;;  %v200_v20 = vmul.f32 %v363_v0, %v327_v12  ;;  %v201_v21 = vmul.f32 %v363_v0, %v328_v13 }
  0x13   : > { %v206_v22 = vadd.f32 %v364_v7, %v194_v14  ;;  %v207_v23 = vadd.f32 %v364_v7, %v195_v15  ;;  %v208_v24 = vadd.f32 %v364_v7, %v196_v16  ;;  %v209_v25 = vadd.f32 %v364_v7, %v197_v17 }
  0x14   : > { %v210_v26 = vadd.f32 %v364_v7, %v198_v18  ;;  %v211_v27 = vadd.f32 %v364_v7, %v199_v19  ;;  %v212_v28 = vadd.f32 %v364_v7, %v200_v20  ;;  %v213_v29 = vadd.f32 %v364_v7, %v201_v21 }
  0x15   : > { %v214_v30 = vmul.f32 0.2, %v206_v22  ;;  %v215_v31 = vmul.f32 0.2, %v207_v23  ;;  %v216_v32 = vmul.f32 0.2, %v208_v24 }
  0x16   : > { %v217_v33 = vmul.f32 0.2, %v209_v25  ;;  %v218_v34 = vmul.f32 0.2, %v210_v26  ;;  %v219_v35 = vmul.f32 0.2, %v211_v27 }
  0x17   : > { %v222_v36 = vmax.f32 %v206_v22, %v214_v30  ;;  %v223_v37 = vmax.f32 %v207_v23, %v215_v31  ;;  %v224_v38 = vmax.f32 %v208_v24, %v216_v32  ;;  %v220_v39 = vmul.f32 0.2, %v212_v28 }
  0x18   : > { %v225_v40 = vmax.f32 %v209_v25, %v217_v33  ;;  %v226_v41 = vmax.f32 %v210_v26, %v218_v34  ;;  %v227_v42 = vmax.f32 %v211_v27, %v219_v35  ;;  %v221_v43 = vmul.f32 0.2, %v213_v29 }
  0x19   : > { %v332_v44 = vpack.c.bf16 %v223_v37, %v222_v36  ;;  %v228_v45 = vmax.f32 %v212_v28, %v220_v39 }
  0x1a   : > { %v337_v46 = vpack.c.bf16 %v225_v40, %v224_v38  ;;  %v342_v47 = vpack.c.bf16 %v227_v42, %v226_v41  ;;  %v229_v48 = vmax.f32 %v213_v29, %v221_v43 }
  0x1b   : > { %333 = vst [vmem:[%s172_s25] sm:$0xff] %v332_v44  }
  0x1c   : > { %352 = vst [vmem:[%s172_s25 + $0x8] sm:$0xff] %v337_v46   ;;  %v347_v49 = vpack.c.bf16 %v229_v48, %v228_v45 }
  0x1d   : > { %353 = vst [vmem:[%s172_s25 + $0x10] sm:$0xff] %v342_v47  }
  0x1e   : > { %354 = vst [vmem:[%s172_s25 + $0x18] sm:$0xff] %v347_v49  }
  0x1f PF: > { %s13_s12 = sadd.s32 1, %s371_s12  }
  0x20   : > { %p10_p4 = scmp.ge.s32.totalorder %s13_s12, 4  }
  0x22   :  { %12 = sbr.rel (!%p10_p4) target bundleno = 1 (0x1), region = 62 }

// kernel: _lambda_.7
= control target key start
LH: loop header
LB: loop body
LE: loop exit
PB: predicated region body
PF: predicated region fallthrough
CT: control target
= control target key end

     0   :  { %s756_s12 = smov 0   ;;  %s758_s13 = smov 0   ;;  %s824_s0 = inlined_call_operand.vmem [shape: bf16[128,128], index: 0, kind: input, shape index: {}]   ;;  %s825_s1 = inlined_call_operand.vmem [shape: bf16[128,128], index: 1, kind: input, shape index: {}]   ;;  %s826_s2 = inlined_call_operand.vmem [shape: bf16[128,128], index: 2, kind: output, shape index: {0}]   ;;  %s827_s3 = inlined_call_operand.vmem [shape: f32[16,128], index: 3, kind: output, shape index: {1}]  }
   0x1   :  { %s760_s14 = smov 0  }
   0x2 LB: > { %s26_s15 = sadd.s32 1, %s730_s13  ;;  %p573_p0 = scmp.ge.s32.totalorder %s734_s14, 1  ;;  %s734_s14 = sphi %s760_s14, %s14_s14   ;;  %s730_s13 = sphi %s758_s13, %s829_s13   ;;  %s726_s12 = sphi %s756_s12, %s828_s12  }
   0x3   : > { %p28_p1 = scmp.ge.s32.totalorder %s26_s15, 2  ;;  %p169_p2 = scmp.lt.s32.totalorder %s734_s14, 3 }
   0x5   : > { %s831_s15 = smov (%p28_p1, %s26_s15), 0  ;;  %p170_p3 = pnand %p573_p0, %p169_p2 }
   0x6   : > { %s574_s24 = sshll.u32 (!%p170_p3), %s726_s12, 3  ;;  %p226_p5 = scmp.lt.s32.totalorder (!%p170_p3), %s726_s12, 1 }
   0x7   : > { %173 = sbr.rel (%p170_p3) target bundleno = 207 (0xcf), region = 28  ;;  %p206_p4 = scmp.lt.s32.totalorder (!%p170_p3), %s574_s24, 15 }
   0xc   : > { %v640_v0 = vld [vmem:[%s825_s1 + $0x38] sm:$0xff]  ;;  %v639_v1 = vld [vmem:[%s825_s1 + $0x30] sm:$0xff]  ;;  %v638_v2 = vld [vmem:[%s825_s1 + $0x28] sm:$0xff]  ;;  %s833_s24 = smov (!%p206_p4, %s574_s24), 15  ;;  %s835_s12 = smov (!%p226_p5, %s726_s12), 1 }
   0xd   : > { %346 = vmatpush.bf16.msra.mxu0 %v640_v0  ;;  %664 = vmatpush.bf16.msra.mxu1 %v640_v0  ;;  %v637_v3 = vld [vmem:[%s825_s1 + $0x20] sm:$0xff]  ;;  %v636_v4 = vld [vmem:[%s825_s1 + $0x18] sm:$0xff]  ;;  %v635_v5 = vld [vmem:[%s825_s1 + $0x10] sm:$0xff]  ;;  %s575_s4 = sshll.u32 %s833_s24, 2  ;;  %s578_s17 = sshll.u32 %s835_s12, 3 }
   0xe   : > { %665 = vmatpush.bf16.msra.mxu2 %v640_v0  ;;  %666 = vmatpush.bf16.msra.mxu3 %v640_v0  ;;  %v634_v6 = vld [vmem:[%s825_s1 + $0x8] sm:$0xff]  ;;  %v633_v7 = vld [vmem:[%s825_s1] sm:$0xff]  ;;  %s212_s9 = scalar_lea.vmem %s824_s0, %s575_s4  ;;  %s224_s16 = scalar_lea.vmem %s826_s2, %s575_s4 }
   0xf   : > { %v629_v8 = vld [vmem:[%s212_s9] sm:$0xff]  ;;  %v630_v9 = vld [vmem:[%s212_s9 + $0x8] sm:$0xff]  ;;  %v631_v10 = vld [vmem:[%s212_s9 + $0x10] sm:$0xff]  ;;  %s229_s20 = scalar_lea.vmem %s827_s3, %s578_s17 }
  0x10   : > { %v632_v11 = vld [vmem:[%s212_s9 + $0x18] sm:$0xff] }
  0x11   : > { %347 = vmatpush.bf16.msra.mxu0 %v639_v1  ;;  %667 = vmatpush.bf16.msra.mxu1 %v639_v1 }
  0x12   : > { %668 = vmatpush.bf16.msra.mxu2 %v639_v1  ;;  %669 = vmatpush.bf16.msra.mxu3 %v639_v1 }
  0x15   : > { %348 = vmatpush.bf16.msra.mxu0 %v638_v2  ;;  %670 = vmatpush.bf16.msra.mxu1 %v638_v2 }
  0x16   : > { %671 = vmatpush.bf16.msra.mxu2 %v638_v2  ;;  %672 = vmatpush.bf16.msra.mxu3 %v638_v2 }
  0x19   : > { %349 = vmatpush.bf16.msra.mxu0 %v637_v3  ;;  %673 = vmatpush.bf16.msra.mxu1 %v637_v3 }
  0x1a   : > { %674 = vmatpush.bf16.msra.mxu2 %v637_v3  ;;  %675 = vmatpush.bf16.msra.mxu3 %v637_v3 }
  0x1d   : > { %350 = vmatpush.bf16.msra.mxu0 %v636_v4  ;;  %676 = vmatpush.bf16.msra.mxu1 %v636_v4 }
  0x1e   : > { %677 = vmatpush.bf16.msra.mxu2 %v636_v4  ;;  %678 = vmatpush.bf16.msra.mxu3 %v636_v4 }
  0x21   : > { %351 = vmatpush.bf16.msra.mxu0 %v635_v5  ;;  %679 = vmatpush.bf16.msra.mxu1 %v635_v5 }
  0x22   : > { %680 = vmatpush.bf16.msra.mxu2 %v635_v5  ;;  %681 = vmatpush.bf16.msra.mxu3 %v635_v5 }
  0x25   : > { %352 = vmatpush.bf16.msra.mxu0 %v634_v6  ;;  %682 = vmatpush.bf16.msra.mxu1 %v634_v6 }
  0x26   : > { %683 = vmatpush.bf16.msra.mxu2 %v634_v6  ;;  %684 = vmatpush.bf16.msra.mxu3 %v634_v6 }
  0x29   : > { %353 = vmatpush.bf16.msra.mxu0 %v633_v7  ;;  %685 = vmatpush.bf16.msra.mxu1 %v633_v7 }
  0x2a   : > { %686 = vmatpush.bf16.msra.mxu2 %v633_v7  ;;  %687 = vmatpush.bf16.msra.mxu3 %v633_v7 }
  0x2c   : > { %354 = vmatmul.bf16.vlgmr.msra.gmra.mxu0 %v629_v8  ;;  %359 = vmatmul.bf16.vlgmr.msra.gmra.mxu1 %v630_v9 }
  0x2d   : > { %364 = vmatmul.bf16.vlgmr.msra.gmra.mxu2 %v631_v10  ;;  %369 = vmatmul.bf16.vlgmr.msra.gmra.mxu3 %v632_v11 }
  0xa9   : > { %v355_v12 = vpop.f32.mrf.mxu0  ;;  %v360_v13 = vpop.f32.mrf.mxu1 }
  0xaa   : > { %v432_v16 = vmul.f32 %v355_v12, %v355_v12  ;;  %v434_v23 = vmul.f32 %v360_v13, %v360_v13 }
  0xb0   : > { %v365_v14 = vpop.f32.mrf.mxu2  ;;  %v370_v15 = vpop.f32.mrf.mxu3 }
  0xb1   : > { %v357_v17 = vpop.f32.mrf.mxu0  ;;  %v362_v18 = vpop.f32.mrf.mxu1  ;;  %v436_v29 = vmul.f32 %v365_v14, %v365_v14  ;;  %v438_v39 = vmul.f32 %v370_v15, %v370_v15 }
  0xb2   : > { %v644_v19 = vpack.c.bf16 %v357_v17, %v355_v12  ;;  %v418_v20 = vadd.f32 %v357_v17, %v355_v12  ;;  %v433_v21 = vmul.f32 %v357_v17, %v357_v17  ;;  %v649_v22 = vpack.c.bf16 %v362_v18, %v360_v13 }
  0xb3   : > { %v435_v27 = vmul.f32 %v362_v18, %v362_v18 }
  0xb4   : > { %645 = vst [vmem:[%s224_s16] sm:$0xff] %v644_v19   ;;  %v440_v24 = vadd.f32 %v433_v21, %v432_v16  ;;  %v419_v25 = vadd.f32 %v418_v20, %v360_v13 }
  0xb5   : > { %661 = vst [vmem:[%s224_s16 + $0x8] sm:$0xff] %v649_v22  }
  0xb6   : > { %v420_v26 = vadd.f32 %v419_v25, %v362_v18  ;;  %v441_v28 = vadd.f32 %v440_v24, %v434_v23 }
  0xb8   : > { %v442_v30 = vadd.f32 %v441_v28, %v435_v27  ;;  %v367_v31 = vpop.f32.mrf.mxu2  ;;  %v421_v32 = vadd.f32 %v420_v26, %v365_v14  ;;  %v372_v33 = vpop.f32.mrf.mxu3 }
  0xb9   : > { %v654_v34 = vpack.c.bf16 %v367_v31, %v365_v14  ;;  %v659_v35 = vpack.c.bf16 %v372_v33, %v370_v15  ;;  %v437_v37 = vmul.f32 %v367_v31, %v367_v31  ;;  %v439_v43 = vmul.f32 %v372_v33, %v372_v33 }
  0xba   : > { %v422_v36 = vadd.f32 %v421_v32, %v367_v31  ;;  %v443_v38 = vadd.f32 %v442_v30, %v436_v29 }
  0xbb   : > { %662 = vst [vmem:[%s224_s16 + $0x10] sm:$0xff] %v654_v34  }
  0xbc   : > { %v444_v40 = vadd.f32 %v443_v38, %v437_v37  ;;  %663 = vst [vmem:[%s224_s16 + $0x18] sm:$0xff] %v659_v35   ;;  %v423_v41 = vadd.f32 %v422_v36, %v370_v15 }
  0xbe   : > { %v424_v42 = vadd.f32 %v423_v41, %v372_v33  ;;  %v445_v44 = vadd.f32 %v444_v40, %v438_v39 }
  0xc0   : > { %v425_v45 = vrot.slane %v424_v42, 4  ;;  %v446_v46 = vadd.f32 %v445_v44, %v439_v43 }
  0xc2   : > { %v426_v47 = vadd.f32 %v425_v45, %v424_v42  ;;  %v447_v48 = vrot.slane %v446_v46, 4 }
  0xc4   : > { %v427_v49 = vrot.slane %v426_v47, 2  ;;  %v448_v50 = vadd.f32 %v447_v48, %v446_v46 }
  0xc6   : > { %v428_v51 = vadd.f32 %v427_v49, %v426_v47  ;;  %v449_v52 = vrot.slane %v448_v50, 2 }
  0xc8   : > { %v429_v53 = vrot.slane %v428_v51, 1  ;;  %v450_v54 = vadd.f32 %v449_v52, %v448_v50 }
  0xca   : > { %v430_v55 = vadd.f32 %v429_v53, %v428_v51  ;;  %v451_v56 = vrot.slane %v450_v54, 1 }
  0xcc   : > { %431 = vst [vmem:[%s229_s20] sm:$0x1] %v430_v55  ;;  %v452_v57 = vadd.f32 %v451_v56, %v450_v54 }
  0xce   : > { %453 = vst [vmem:[%s229_s20 + $0x1] sm:$0x1] %v452_v57 }
  0xcf PF: > { %s14_s14 = sadd.s32 1, %s734_s14   ;;  %s828_s12 = smov %s730_s13 }
  0xd0   : > { %p11_p6 = scmp.ge.s32.totalorder %s14_s14, 4   ;;  %s829_s13 = smov %s831_s15 }
  0xd2   :  { %13 = sbr.rel (!%p11_p6) target bundleno = 2 (0x2), region = 81 }

// kernel: _lambda_.9
= control target key start
LH: loop header
LB: loop body
LE: loop exit
PB: predicated region body
PF: predicated region fallthrough
CT: control target
= control target key end

     0   :  { %s600_s12 = smov 0   ;;  %s602_s13 = smov 0   ;;  %s665_s0 = inlined_call_operand.vmem [shape: bf16[32,128], index: 0, kind: input, shape index: {}]   ;;  %s666_s1 = inlined_call_operand.vmem [shape: bf16[128,128], index: 1, kind: input, shape index: {}]   ;;  %s667_s2 = inlined_call_operand.vmem [shape: bf16[32,128], index: 2, kind: output, shape index: {0}]   ;;  %s668_s3 = inlined_call_operand.vmem [shape: f32[16,128], index: 3, kind: output, shape index: {1}]  }
   0x1   :  { %s604_s14 = smov 0  }
   0x2 LB: > { %s26_s15 = sadd.s32 1, %s574_s13  ;;  %p474_p0 = scmp.ge.s32.totalorder %s578_s14, 1  ;;  %s578_s14 = sphi %s604_s14, %s14_s14   ;;  %s574_s13 = sphi %s602_s13, %s670_s13   ;;  %s570_s12 = sphi %s600_s12, %s669_s12  }
   0x3   : > { %p28_p1 = scmp.ge.s32.totalorder %s26_s15, 2  ;;  %p169_p2 = scmp.lt.s32.totalorder %s578_s14, 3 }
   0x5   : > { %s672_s15 = smov (%p28_p1, %s26_s15), 0  ;;  %p170_p3 = pnand %p474_p0, %p169_p2 }
   0x6   : > { %s475_s24 = sshll.u32 (!%p170_p3), %s570_s12, 1  ;;  %p226_p5 = scmp.lt.s32.totalorder (!%p170_p3), %s570_s12, 1 }
   0x7   : > { %173 = sbr.rel (%p170_p3) target bundleno = 195 (0xc3), region = 28  ;;  %p206_p4 = scmp.lt.s32.totalorder (!%p170_p3), %s475_s24, 3 }
   0xc   : > { %v526_v0 = vld [vmem:[%s666_s1 + $0x38] sm:$0xff]  ;;  %v525_v1 = vld [vmem:[%s666_s1 + $0x30] sm:$0xff]  ;;  %v524_v2 = vld [vmem:[%s666_s1 + $0x28] sm:$0xff]  ;;  %s674_s24 = smov (!%p206_p4, %s475_s24), 3  ;;  %s676_s12 = smov (!%p226_p5, %s570_s12), 1 }
   0xd   : > { %310 = vmatpush.bf16.msra.mxu0 %v526_v0  ;;  %v523_v3 = vld [vmem:[%s666_s1 + $0x20] sm:$0xff]  ;;  %v522_v4 = vld [vmem:[%s666_s1 + $0x18] sm:$0xff]  ;;  %v521_v5 = vld [vmem:[%s666_s1 + $0x10] sm:$0xff]  ;;  %s476_s4 = sshll.u32 %s674_s24, 2  ;;  %s479_s17 = sshll.u32 %s676_s12, 3 }
   0xe   : > { %v520_v6 = vld [vmem:[%s666_s1 + $0x8] sm:$0xff]  ;;  %v519_v7 = vld [vmem:[%s666_s1] sm:$0xff]  ;;  %s212_s9 = scalar_lea.vmem %s665_s0, %s476_s4  ;;  %s224_s16 = scalar_lea.vmem %s667_s2, %s476_s4 }
   0xf   : > { %v518_v8 = vld [vmem:[%s212_s9] sm:$0xff]  ;;  %s229_s20 = scalar_lea.vmem %s668_s3, %s479_s17 }
  0x11   : > { %311 = vmatpush.bf16.msra.mxu0 %v525_v1 }
  0x15   : > { %312 = vmatpush.bf16.msra.mxu0 %v524_v2 }
  0x19   : > { %313 = vmatpush.bf16.msra.mxu0 %v523_v3 }
  0x1d   : > { %314 = vmatpush.bf16.msra.mxu0 %v522_v4 }
  0x21   : > { %315 = vmatpush.bf16.msra.mxu0 %v521_v5 }
  0x25   : > { %316 = vmatpush.bf16.msra.mxu0 %v520_v6 }
  0x29   : > { %317 = vmatpush.bf16.msra.mxu0 %v519_v7 }
  0x2c   : > { %318 = vmatmul.bf16.vlgmr.msra.gmra.mxu0 %v518_v8 }
  0xa9   : > { %v319_v9 = vpop.f32.mrf.mxu0 }
  0xaa   : > { %v345_v11 = vmul.f32 %v319_v9, %v319_v9 }
  0xb1   : > { %v321_v10 = vpop.f32.mrf.mxu0 }
  0xb2   : > { %v530_v12 = vpack.c.bf16 %v321_v10, %v319_v9  ;;  %v337_v13 = vadd.f32 %v321_v10, %v319_v9  ;;  %v346_v14 = vmul.f32 %v321_v10, %v321_v10 }
  0xb4   : > { %531 = vst [vmem:[%s224_s16] sm:$0xff] %v530_v12   ;;  %v338_v15 = vrot.slane %v337_v13, 4  ;;  %v347_v16 = vadd.f32 %v346_v14, %v345_v11 }
  0xb6   : > { %v339_v17 = vadd.f32 %v338_v15, %v337_v13  ;;  %v348_v18 = vrot.slane %v347_v16, 4 }
  0xb8   : > { %v340_v19 = vrot.slane %v339_v17, 2  ;;  %v349_v20 = vadd.f32 %v348_v18, %v347_v16 }
  0xba   : > { %v341_v21 = vadd.f32 %v340_v19, %v339_v17  ;;  %v350_v22 = vrot.slane %v349_v20, 2 }
  0xbc   : > { %v342_v23 = vrot.slane %v341_v21, 1  ;;  %v351_v24 = vadd.f32 %v350_v22, %v349_v20 }
  0xbe   : > { %v343_v25 = vadd.f32 %v342_v23, %v341_v21  ;;  %v352_v26 = vrot.slane %v351_v24, 1 }
  0xc0   : > { %344 = vst [vmem:[%s229_s20] sm:$0x1] %v343_v25  ;;  %v353_v27 = vadd.f32 %v352_v26, %v351_v24 }
  0xc2   : > { %354 = vst [vmem:[%s229_s20 + $0x1] sm:$0x1] %v353_v27 }
  0xc3 PF: > { %s14_s14 = sadd.s32 1, %s578_s14   ;;  %s669_s12 = smov %s574_s13 }
  0xc4   : > { %p11_p6 = scmp.ge.s32.totalorder %s14_s14, 4   ;;  %s670_s13 = smov %s672_s15 }
  0xc6   :  { %13 = sbr.rel (!%p11_p6) target bundleno = 2 (0x2), region = 81 }

// kernel: _lambda_.10
= control target key start
LH: loop header
LB: loop body
LE: loop exit
PB: predicated region body
PF: predicated region fallthrough
CT: control target
= control target key end

     0   :  { %s312_s12 = smov 0   ;;  %s335_s0 = inlined_call_operand.vmem [shape: bf16[32,128], index: 0, kind: input, shape index: {}]   ;;  %s336_s1 = inlined_call_operand.vmem [shape: f32[1,128], index: 1, kind: input, shape index: {}]   ;;  %s337_s2 = inlined_call_operand.vmem [shape: f32[1,128], index: 2, kind: input, shape index: {}]   ;;  %s338_s3 = inlined_call_operand.vmem [shape: bf16[32,128], index: 3, kind: output, shape index: {}]  }
   0x1 LB: > { %s254_s13 = sadd.s32 4294967295, %s290_s12   ;;  %p258_p0 = scmp.ge.s32.totalorder %s290_s12, 1  ;;  %s290_s12 = sphi %s312_s12, %s13_s12  }
   0x2   : > { %p138_p1 = scmp.lt.s32.totalorder %s290_s12, 3 }
   0x4   : > { %p139_p2 = pnand %p258_p0, %p138_p1 }
   0x5   : > { %s259_s14 = sshll.u32 (!%p139_p2), %s254_s13, 1 }
   0x6   : > { %142 = sbr.rel (%p139_p2) target bundleno = 28 (0x1c), region = 32  ;;  %p163_p3 = scmp.lt.s32.totalorder (!%p139_p2), %s259_s14, 3 }
   0xb   : > { %s340_s14 = smov (!%p163_p3, %s259_s14), 3  ;;  %v282_v0 = vld [vmem:[%s336_s1] ss:$0 sm:$0xff] }
   0xc   : > { %s260_s15 = sshll.u32 %s340_s14, 2  ;;  %v283_v4 = vld [vmem:[%s337_s2] ss:$0 sm:$0xff] }
   0xd   : > { %s166_s18 = scalar_lea.vmem %s335_s0, %s260_s15  ;;  %s172_s25 = scalar_lea.vmem %s338_s3, %s260_s15 }
   0xe   : > { %v266_v1 = vld [vmem:[%s166_s18] sm:$0xff]  }
   0xf   : > { %v267_v2 = vunpack.c.l.bf16 %v266_v1  ;;  %v268_v3 = vunpack.c.h.bf16 %v266_v1 }
  0x11   : > { %v182_v5 = vmul.f32 %v282_v0, %v267_v2  ;;  %v183_v6 = vmul.f32 %v282_v0, %v268_v3 }
  0x13   : > { %v188_v7 = vadd.f32 %v283_v4, %v182_v5  ;;  %v189_v8 = vadd.f32 %v283_v4, %v183_v6 }
  0x15   : > { %v190_v9 = vmul.f32 0.2, %v188_v7  ;;  %v191_v10 = vmul.f32 0.2, %v189_v8 }
  0x17   : > { %v192_v11 = vmax.f32 %v188_v7, %v190_v9  ;;  %v193_v12 = vmax.f32 %v189_v8, %v191_v10 }
  0x19   : > { %v272_v13 = vpack.c.bf16 %v193_v12, %v192_v11 }
  0x1b   : > { %273 = vst [vmem:[%s172_s25] sm:$0xff] %v272_v13  }
  0x1c PF: > { %s13_s12 = sadd.s32 1, %s290_s12  }
  0x1d   : > { %p10_p4 = scmp.ge.s32.totalorder %s13_s12, 4  }
  0x1f   :  { %12 = sbr.rel (!%p10_p4) target bundleno = 1 (0x1), region = 62 }

// kernel: _lambda_.11
= control target key start
LH: loop header
LB: loop body
LE: loop exit
PB: predicated region body
PF: predicated region fallthrough
CT: control target
= control target key end

     0   :  { %s373_s1 = inlined_call_operand.vmem [shape: bf16[256,128], index: 1, kind: input, shape index: {}]   ;;  %s374_s0 = inlined_call_operand.vmem [shape: bf16[16,256], index: 0, kind: input, shape index: {}]   ;;  %s375_s2 = inlined_call_operand.vmem [shape: f32[16,128], index: 2, kind: output, shape index: {}]  }
   0x1   :  { %v283_v0 = vld [vmem:[%s373_s1 + $0x38] sm:$0xff]  ;;  %v282_v2 = vld [vmem:[%s373_s1 + $0x30] sm:$0xff]  ;;  %v281_v4 = vld [vmem:[%s373_s1 + $0x28] sm:$0xff] }
   0x2   :  { %v291_v1 = vld [vmem:[%s373_s1 + $0x78] sm:$0xff]  ;;  %159 = vmatpush.bf16.msra.mxu0 %v283_v0  ;;  %v290_v3 = vld [vmem:[%s373_s1 + $0x70] sm:$0xff]  ;;  %v289_v5 = vld [vmem:[%s373_s1 + $0x68] sm:$0xff] }
   0x3   :  { %173 = vmatpush.bf16.msra.mxu1 %v291_v1  ;;  %v280_v6 = vld [vmem:[%s373_s1 + $0x20] sm:$0xff]  ;;  %v279_v8 = vld [vmem:[%s373_s1 + $0x18] sm:$0xff]  ;;  %v278_v10 = vld [vmem:[%s373_s1 + $0x10] sm:$0xff] }
   0x4   :  { %v288_v7 = vld [vmem:[%s373_s1 + $0x60] sm:$0xff]  ;;  %v287_v9 = vld [vmem:[%s373_s1 + $0x58] sm:$0xff]  ;;  %v286_v11 = vld [vmem:[%s373_s1 + $0x50] sm:$0xff] }
   0x5   :  { %v277_v12 = vld [vmem:[%s373_s1 + $0x8] sm:$0xff]  ;;  %v276_v14 = vld [vmem:[%s373_s1] sm:$0xff] }
   0x6   :  { %160 = vmatpush.bf16.msra.mxu0 %v282_v2  ;;  %v285_v13 = vld [vmem:[%s373_s1 + $0x48] sm:$0xff]  ;;  %v284_v15 = vld [vmem:[%s373_s1 + $0x40] sm:$0xff] }
   0x7   :  { %174 = vmatpush.bf16.msra.mxu1 %v290_v3  ;;  %v204_v16 = vld [vmem:[%s374_s0] sm:$0xf]  ;;  %v275_v17 = vld [vmem:[%s374_s0 + $0x4] sm:$0xf0]  ;;  %v274_v18 = vld [vmem:[%s374_s0 + $0x4] sm:$0xf] }
   0x8   :  { %v206_v19 = vld [vmem:[%s374_s0 + $0x8] sm:$0xf0]  ;;  %v205_v20 = vor.u32 %v275_v17, %v204_v16 }
   0x9   :  { %v209_v21 = vor.u32 %v274_v18, %v206_v19 }
   0xa   :  { %161 = vmatpush.bf16.msra.mxu0 %v281_v4 }
   0xb   :  { %175 = vmatpush.bf16.msra.mxu1 %v289_v5 }
   0xe   :  { %162 = vmatpush.bf16.msra.mxu0 %v280_v6 }
   0xf   :  { %176 = vmatpush.bf16.msra.mxu1 %v288_v7 }
  0x12   :  { %163 = vmatpush.bf16.msra.mxu0 %v279_v8 }
  0x13   :  { %177 = vmatpush.bf16.msra.mxu1 %v287_v9 }
  0x16   :  { %164 = vmatpush.bf16.msra.mxu0 %v278_v10 }
  0x17   :  { %178 = vmatpush.bf16.msra.mxu1 %v286_v11 }
  0x1a   :  { %165 = vmatpush.bf16.msra.mxu0 %v277_v12 }
  0x1b   :  { %179 = vmatpush.bf16.msra.mxu1 %v285_v13 }
  0x1e   :  { %166 = vmatpush.bf16.msra.mxu0 %v276_v14 }
  0x1f   :  { %180 = vmatpush.bf16.msra.mxu1 %v284_v15 }
  0x21   :  { %167 = vmatmul.bf16.vlgmr.msra.gmra.mxu0 %v205_v20 }
  0x22   :  { %181 = vmatmul.bf16.vlgmr.msra.gmra.mxu1 %v209_v21 }
  0x9e   :  { %v168_v22 = vpop.f32.mrf.mxu0 }
  0x9f   :  { %v182_v23 = vpop.f32.mrf.mxu1 }
  0xa0   :  { %v183_v24 = vadd.f32 %v182_v23, %v168_v22 }
  0xa2   :  { %196 = vst [vmem:[%s375_s2] sm:$0xff] %v183_v24 }
  0xa6   :  { %v170_v25 = vpop.f32.mrf.mxu0 }
  0xa7   :  { %v184_v26 = vpop.f32.mrf.mxu1 }
  0xa8   :  { %v185_v27 = vadd.f32 %v184_v26, %v170_v25 }
  0xaa   :  { %197 = vst [vmem:[%s375_s2 + $0x8] sm:$0xff] %v185_v27 }

</bundles_post_ra>
